<compile_context>
chip_gen: v7x
topology: tpu7x:2x2x1
jax: 0.10.0
libtpu: 0.0.40
codegen_flags: <defaults>
</compile_context>

<pallas_src>
from functools import partial

import numpy as np
import jax
import jax.numpy as jnp
from jax import lax
from jax.experimental import pallas as pl
from jax.experimental.pallas import tpu as pltpu

# Module defaults
MAX_HOP = 1
DILATION = 1
STRATEGY = "uniform"


def _ggn_kernel(idx_lhs_ref, idx_rhs_ref, ad_ref, adj_ref):
    # idx_lhs_ref : (1, 1, E2_pad)      int32  row endpoints (j), lane-resident
    # idx_rhs_ref : (1, E2_pad, 1)      int32  col endpoints (i), sublane-resident
    # ad_ref      : (1, N_pad, N_pad)   f32    normalized adjacency (A @ Dn)
    # adj_ref     : (1, N_pad, N_pad)   f32    binary adjacency
    e2 = idx_lhs_ref.shape[-1]
    n_pad = ad_ref.shape[-1]

    idx_lhs = idx_lhs_ref[0]                                   # (1, E2_pad)
    idx_rhs = idx_rhs_ref[0]                                   # (E2_pad, 1)

    # One-hot scatter matrices, built in-kernel in MXU-canonical layout.
    # oh_lhs[j, e] = (idx_lhs[e] == j)  -> [M=N_pad, K=E2_pad]
    # oh_rhs[e, i] = (idx_rhs[e] == i)  -> [K=E2_pad, N=N_pad]
    # Sentinel -1 entries (edge-axis padding) never match any node id.
    row_iota = lax.broadcasted_iota(jnp.int32, (n_pad, e2), 0)
    col_iota = lax.broadcasted_iota(jnp.int32, (e2, n_pad), 1)
    oh_lhs = (idx_lhs == row_iota).astype(jnp.bfloat16)
    oh_rhs = (idx_rhs == col_iota).astype(jnp.bfloat16)

    # Fused symmetric edge scatter: counts[j, i] = #edge endpoints matching (j, i).
    # idx_lhs = [dst || src || -1], idx_rhs = [src || dst || -1] => one canonical
    # [M,K]@[K,N] contraction covers both A[j, i] = 1 and A[i, j] = 1; the
    # self-links appended in the wrapper supply the diagonal.
    counts = jnp.dot(oh_lhs, oh_rhs, preferred_element_type=jnp.float32)
    a_bin = (counts > 0.0).astype(jnp.float32)

    if MAX_HOP > 1:
        # Self-links make diag(a_bin) nonzero, so a_bin^h > 0 <=> hop_dis <= h.
        # bf16 operands (exact 0/1) with f32 accumulation keep the >0 test exact
        # while running the MXU at the full bf16 rate.
        a_bf = a_bin.astype(jnp.bfloat16)
        reach = a_bf
        for _ in range(MAX_HOP - 1):
            reach = jnp.dot(reach, a_bf, preferred_element_type=jnp.float32)
            reach = (reach > 0.0).astype(jnp.bfloat16)
        adjacency = reach.astype(jnp.float32)
    else:
        # MAX_HOP == 1: diagonal already present via self-links => adjacency == a_bin.
        adjacency = a_bin

    # normalize_digraph: AD = A @ Dn, Dn = diag(1 / colsum), 0 where colsum == 0.
    dl = jnp.sum(adjacency, axis=0, keepdims=True)             # (1, N_pad) column sums
    inv = jnp.where(dl > 0.0, pl.reciprocal(dl, approx=False), 0.0)

    adj_ref[0] = adjacency
    ad_ref[0] = adjacency * inv                                 # scale each column


@partial(jax.jit, static_argnums=(1,))
def graph_gen_network(x, num_node):
    """x: int edge list (B, 2, E).  Returns (A (B,1,N,N) f32, adjacency (B,N,N) f32)."""
    b, two, e = x.shape
    assert two == 2
    x = x.astype(jnp.int32)

    # Append self-links (matches np.concatenate([edge, node_selflink], axis=1)).
    self_link = jnp.broadcast_to(
        jnp.arange(num_node, dtype=jnp.int32)[None, None, :], (b, 2, num_node))
    edges = jnp.concatenate([x, self_link], axis=2)            # (B, 2, E + N)
    src, dst = edges[:, 0, :], edges[:, 1, :]

    # Fused scatter operands: LHS endpoints index output rows (j), RHS endpoints
    # index output cols (i).  Pad the edge axis to a multiple of 128 with -1
    # sentinels so the one-hots are dense and the MXU K-depth is aligned.
    idx_lhs = jnp.concatenate([dst, src], axis=1)              # (B, 2*(E+N))
    idx_rhs = jnp.concatenate([src, dst], axis=1)              # (B, 2*(E+N))
    e2 = 2 * (e + num_node)
    e2_pad = ((e2 + 127) // 128) * 128
    if e2_pad != e2:
        fill = jnp.full((b, e2_pad - e2), -1, dtype=jnp.int32)
        idx_lhs = jnp.concatenate([idx_lhs, fill], axis=1)
        idx_rhs = jnp.concatenate([idx_rhs, fill], axis=1)
    idx_lhs = idx_lhs[:, None, :]                              # (B, 1, E2_pad)  lanes
    idx_rhs = idx_rhs[:, :, None]                              # (B, E2_pad, 1)  sublanes

    n_pad = ((num_node + 127) // 128) * 128                    # lane-dense outputs
    out_shape = (
        jax.ShapeDtypeStruct((b, n_pad, n_pad), jnp.float32),  # normalized A
        jax.ShapeDtypeStruct((b, n_pad, n_pad), jnp.float32),  # binary adjacency
    )

    ad_pad, adj_pad = pl.pallas_call(
        _ggn_kernel,
        out_shape=out_shape,
        grid=(b,),
        in_specs=[
            pl.BlockSpec((1, 1, e2_pad), lambda i: (i, 0, 0)),
            pl.BlockSpec((1, e2_pad, 1), lambda i: (i, 0, 0)),
        ],
        out_specs=(
            pl.BlockSpec((1, n_pad, n_pad), lambda i: (i, 0, 0)),
            pl.BlockSpec((1, n_pad, n_pad), lambda i: (i, 0, 0)),
        ),
        compiler_params=pltpu.CompilerParams(
            dimension_semantics=("parallel",)),
    )(idx_lhs, idx_rhs)

    # Slice the lane padding back off (layout plumbing, fused by jit).
    A = ad_pad[:, None, :num_node, :num_node]                  # uniform strategy: K == 1
    adjacency = adj_pad[:, :num_node, :num_node]
    return A, adjacency


# ---------------- numpy reference (mirrors the PyTorch forward) ----------------
def _get_hop_distance(num_node, edge, max_hop=1):
    A = np.zeros((num_node, num_node))
    for k in range(edge.shape[1]):
        i, j = edge[0, k], edge[1, k]
        A[j, i] = 1
        A[i, j] = 1
    hop_dis = np.zeros((num_node, num_node)) + np.inf
    transfer_mat = [np.linalg.matrix_power(A, d) for d in range(max_hop + 1)]
    arrive_mat = np.stack(transfer_mat) > 0
    for d in range(max_hop, -1, -1):
        hop_dis[arrive_mat[d]] = d
    return hop_dis


def _normalize_digraph(A):
    Dl = np.sum(A, 0)
    Dn = np.zeros_like(A)
    for i in range(A.shape[0]):
        if Dl[i] > 0:
            Dn[i, i] = Dl[i] ** (-1)
    return np.dot(A, Dn)


def _ref_forward(x_np, num_node, max_hop=1, dilation=1):
    selflink = np.array([[i, i] for i in range(num_node)]).T
    A_list, adj_list = [], []
    for i in range(x_np.shape[0]):
        edge = np.concatenate([x_np[i], selflink], axis=1)
        hop_dis = _get_hop_distance(num_node, edge, max_hop=max_hop)
        adjacency = np.zeros((num_node, num_node))
        for hop in range(0, max_hop + 1, dilation):
            adjacency[hop_dis == hop] = 1
        A_list.append(_normalize_digraph(adjacency)[None])   # uniform: (1, N, N)
        adj_list.append(adjacency)
    return np.stack(A_list), np.stack(adj_list)


if __name__ == "__main__":
    num_node = 19          # FAN_19-sized graph, kept small
    batch, num_edges = 2, 24
    key = jax.random.PRNGKey(0)
    x = jax.random.randint(key, (batch, 2, num_edges), 0, num_node, dtype=jnp.int32)

    A, adj = graph_gen_network(x, num_node)
    A, adj = jax.block_until_ready((A, adj))

    A_ref, adj_ref = _ref_forward(np.asarray(x), num_node, MAX_HOP, DILATION)
    np.testing.assert_allclose(np.asarray(A), A_ref.astype(np.float32),
                               rtol=1e-5, atol=1e-5)
    np.testing.assert_allclose(np.asarray(adj), adj_ref.astype(np.float32),
                               rtol=1e-5, atol=1e-5)
    print("KERNEL_OK")
</pallas_src>

<mosaic_0001>
module attributes {stable_mosaic.version = 11 : i64} {
  func.func @_ggn_kernel(%arg0: i32, %arg1: memref<1x1x128xi32, #tpu.memory_space<vmem>>, %arg2: memref<1x128x1xi32, #tpu.memory_space<vmem>>, %arg3: memref<1x128x128xf32, #tpu.memory_space<vmem>>, %arg4: memref<1x128x128xf32, #tpu.memory_space<vmem>>) attributes {dimension_semantics = [#tpu.dimension_semantics<parallel>], iteration_bounds = array<i64: 2>, scalar_prefetch = 0 : i64, scratch_operands = 0 : i64, tpu.core_type = #tpu.core_type<tc>, window_params = [{transform_indices = @transform_0, window_bounds = array<i64: 1, 1, 128>}, {transform_indices = @transform_1, window_bounds = array<i64: 1, 128, 1>}, {transform_indices = @transform_2, window_bounds = array<i64: 1, 128, 128>}, {transform_indices = @transform_3, window_bounds = array<i64: 1, 128, 128>}]} {
    %c0 = arith.constant 0 : index
    %c0_0 = arith.constant 0 : index
    %c0_1 = arith.constant 0 : index
    %0 = vector.load %arg1[%c0, %c0_0, %c0_1] : memref<1x1x128xi32, #tpu.memory_space<vmem>>, vector<1x1x128xi32>
    %1 = vector.shape_cast %0 : vector<1x1x128xi32> to vector<1x128xi32>
    %c0_2 = arith.constant 0 : index
    %c0_3 = arith.constant 0 : index
    %c0_4 = arith.constant 0 : index
    %2 = vector.load %arg2[%c0_2, %c0_3, %c0_4] : memref<1x128x1xi32, #tpu.memory_space<vmem>>, vector<1x128x1xi32>
    %3 = vector.shape_cast %2 : vector<1x128x1xi32> to vector<128x1xi32>
    %4 = tpu.iota {dimensions = array<i32: 0>} : vector<128x128xi32>
    %5 = tpu.iota {dimensions = array<i32: 1>} : vector<128x128xi32>
    %6 = vector.broadcast %1 : vector<1x128xi32> to vector<128x128xi32>
    %7 = arith.cmpi eq, %6, %4 : vector<128x128xi32>
    %8 = arith.extui %7 : vector<128x128xi1> to vector<128x128xi32>
    %9 = arith.sitofp %8 : vector<128x128xi32> to vector<128x128xf32>
    %10 = arith.truncf %9 : vector<128x128xf32> to vector<128x128xbf16>
    %11 = vector.broadcast %3 : vector<128x1xi32> to vector<128x128xi32>
    %12 = arith.cmpi eq, %11, %5 : vector<128x128xi32>
    %13 = arith.extui %12 : vector<128x128xi1> to vector<128x128xi32>
    %14 = arith.sitofp %13 : vector<128x128xi32> to vector<128x128xf32>
    %15 = arith.truncf %14 : vector<128x128xf32> to vector<128x128xbf16>
    %cst = arith.constant dense<0.000000e+00> : vector<128x128xf32>
    %16 = tpu.matmul %10, %15, %cst {dimension_numbers = #tpu.dot_dimension_numbers<[1], [0], [0], [1], [0, 0, 1, 1], [], []>} : vector<128x128xbf16>, vector<128x128xbf16>, vector<128x128xf32> -> vector<128x128xf32>
    %cst_5 = arith.constant 0.000000e+00 : f32
    %17 = vector.broadcast %cst_5 : f32 to vector<128x128xf32>
    %18 = arith.cmpf ogt, %16, %17 : vector<128x128xf32>
    %19 = arith.extui %18 : vector<128x128xi1> to vector<128x128xi32>
    %20 = arith.sitofp %19 : vector<128x128xi32> to vector<128x128xf32>
    %cst_6 = arith.constant dense<0.000000e+00> : vector<128xf32>
    %21 = vector.multi_reduction <add>, %20, %cst_6 [0] : vector<128x128xf32> to vector<128xf32>
    %22 = vector.shape_cast %21 : vector<128xf32> to vector<1x128xf32>
    %cst_7 = arith.constant 0.000000e+00 : f32
    %23 = vector.broadcast %cst_7 : f32 to vector<1x128xf32>
    %24 = arith.cmpf ogt, %22, %23 : vector<1x128xf32>
    %25 = tpu.reciprocal %22 : vector<1x128xf32> -> vector<1x128xf32>
    %cst_8 = arith.constant 0.000000e+00 : f32
    %26 = vector.broadcast %cst_8 : f32 to vector<1x128xf32>
    %27 = arith.select %24, %25, %26 : vector<1x128xi1>, vector<1x128xf32>
    %c0_9 = arith.constant 0 : index
    %c0_10 = arith.constant 0 : index
    %c0_11 = arith.constant 0 : index
    %28 = vector.load %arg4[%c0_9, %c0_10, %c0_11] : memref<1x128x128xf32, #tpu.memory_space<vmem>>, vector<1x128x128xf32>
    %29 = vector.shape_cast %28 : vector<1x128x128xf32> to vector<128x128xf32>
    %30 = vector.shape_cast %20 : vector<128x128xf32> to vector<1x128x128xf32>
    tpu.vector_store %arg4[%c0_9, %c0_10, %c0_11], %30 {strides = array<i32>} : memref<1x128x128xf32, #tpu.memory_space<vmem>>, vector<1x128x128xf32>,
    %31 = vector.broadcast %27 : vector<1x128xf32> to vector<128x128xf32>
    %32 = arith.mulf %20, %31 : vector<128x128xf32>
    %c0_12 = arith.constant 0 : index
    %c0_13 = arith.constant 0 : index
    %c0_14 = arith.constant 0 : index
    %33 = vector.load %arg3[%c0_12, %c0_13, %c0_14] : memref<1x128x128xf32, #tpu.memory_space<vmem>>, vector<1x128x128xf32>
    %34 = vector.shape_cast %33 : vector<1x128x128xf32> to vector<128x128xf32>
    %35 = vector.shape_cast %32 : vector<128x128xf32> to vector<1x128x128xf32>
    tpu.vector_store %arg3[%c0_12, %c0_13, %c0_14], %35 {strides = array<i32>} : memref<1x128x128xf32, #tpu.memory_space<vmem>>, vector<1x128x128xf32>,
    return
  }
  func.func @transform_0(%arg0: i32) -> (i32, i32, i32) {
    %c0_i32 = arith.constant 0 : i32
    %c0_i32_0 = arith.constant 0 : i32
    %c0_i32_1 = arith.constant 0 : i32
    return %arg0, %c0_i32, %c0_i32_0 : i32, i32, i32
  }
  func.func @transform_1(%arg0: i32) -> (i32, i32, i32) {
    %c0_i32 = arith.constant 0 : i32
    %c0_i32_0 = arith.constant 0 : i32
    %c0_i32_1 = arith.constant 0 : i32
    return %arg0, %c0_i32, %c0_i32_0 : i32, i32, i32
  }
  func.func @transform_2(%arg0: i32) -> (i32, i32, i32) {
    %c0_i32 = arith.constant 0 : i32
    %c0_i32_0 = arith.constant 0 : i32
    %c0_i32_1 = arith.constant 0 : i32
    return %arg0, %c0_i32, %c0_i32_0 : i32, i32, i32
  }
  func.func @transform_3(%arg0: i32) -> (i32, i32, i32) {
    %c0_i32 = arith.constant 0 : i32
    %c0_i32_0 = arith.constant 0 : i32
    %c0_i32_1 = arith.constant 0 : i32
    return %arg0, %c0_i32, %c0_i32_0 : i32, i32, i32
  }
}

</mosaic_0001>

<bundles_post_ra>
// kernel: graph_gen_network.1
= control target key start
LH: loop header
LB: loop body
LE: loop exit
PB: predicated region body
PF: predicated region fallthrough
CT: control target
= control target key end

     0   :  { %s920_s12 = smov 0   ;;  %s1127_s0 = inlined_call_operand.vmem [shape: s32[2,1,128], index: 0, kind: input, shape index: {}]   ;;  %s1128_s1 = inlined_call_operand.vmem [shape: s32[2,128,1], index: 1, kind: input, shape index: {}]   ;;  %s1129_s2 = inlined_call_operand.vmem [shape: f32[2,128,128], index: 2, kind: output, shape index: {0}]   ;;  %s1130_s3 = inlined_call_operand.vmem [shape: f32[2,128,128], index: 3, kind: output, shape index: {1}]  }
   0x1 LB: > { %s713_s13 = sadd.s32 4294967295, %s895_s12   ;;  %p717_p0 = scmp.ge.s32.totalorder %s895_s12, 1  ;;  %s895_s12 = sphi %s920_s12, %s14_s12  }
   0x2   : > { %p148_p1 = scmp.lt.s32.totalorder %s895_s12, 3 }
   0x4   : > { %p149_p2 = pnand %p717_p0, %p148_p1 }
   0x5   : > { %p180_p3 = scmp.lt.s32.totalorder (!%p149_p2), %s713_s13, 1  ;;  %v897_v0 = vmov (!%p149_p2), 0   ;;  %v216_v17 = vlaneseq (!%p149_p2)  ;;  %v898_v23 = vmov (!%p149_p2), 1.0|1.0   ;;  %v899_v63 = vmov (!%p149_p2), 0.0  }
   0x6   : > { %152 = sbr.rel (%p149_p2) target bundleno = 465 (0x1d1), region = 28  ;;  %886 = vset.pattern.permute.xlu1 (!%p149_p2), %v897_v0  ;;  %885 = vset.pattern.permute.xlu0 (!%p149_p2), %v897_v0 }
   0x7   : > { %v217_v18 = vshrl.u32 (!%p149_p2), %v216_v17, 7  ;;  %v967_v44 = vand.u32 (!%p149_p2), 127, %v216_v17 }
   0x9   : > { %v218_v19 = vadd.s32 (!%p149_p2), 8, %v217_v18  ;;  %v219_v21 = vadd.s32 (!%p149_p2), 16, %v217_v18  ;;  %v220_v22 = vadd.s32 (!%p149_p2), 24, %v217_v18  ;;  %v221_v25 = vadd.s32 (!%p149_p2), 32, %v217_v18 }
   0xa   : > { %v222_v26 = vadd.s32 (!%p149_p2), 40, %v217_v18  ;;  %v223_v27 = vadd.s32 (!%p149_p2), 48, %v217_v18  ;;  %v224_v28 = vadd.s32 (!%p149_p2), 56, %v217_v18  ;;  %v225_v31 = vadd.s32 (!%p149_p2), 64, %v217_v18 }
   0xb   : > { %v226_v32 = vadd.s32 (!%p149_p2), 72, %v217_v18  ;;  %v227_v33 = vadd.s32 (!%p149_p2), 80, %v217_v18  ;;  %v228_v34 = vadd.s32 (!%p149_p2), 88, %v217_v18  ;;  %v229_v35 = vadd.s32 (!%p149_p2), 96, %v217_v18 }
   0xc   : > { %v230_v36 = vadd.s32 (!%p149_p2), 104, %v217_v18  ;;  %v231_v37 = vadd.s32 (!%p149_p2), 112, %v217_v18  ;;  %v232_v38 = vadd.s32 (!%p149_p2), 120, %v217_v18 }
   0xd   : > { %s1144_s13 = smov (!%p180_p3, %s713_s13), 1 }
   0xe   : > { %s931_s14 = sshll.u32 %s1144_s13, 7  ;;  %s182_s20 = scalar_lea.vmem %s1127_s0, %s1144_s13 }
   0xf   : > { %s187_s17 = scalar_lea.vmem %s1128_s1, %s931_s14  ;;  %v724_v20 = vld [vmem:[%s182_s20] ss:$0 sm:$0xff]  ;;  %s1039_s23 = scalar_lea.vmem %s1130_s3, %s931_s14 }
  0x10   : > { %v202_v1 = vld [vmem:[%s187_s17 + $0x10] sm:$0xff]  ;;  %v200_v2 = vld [vmem:[%s187_s17] sm:$0xff]  ;;  %v203_v3 = vld [vmem:[%s187_s17 + $0x18] sm:$0xff]  ;;  %vm239_vm0 = vcmp.eq.s32.totalorder %v724_v20, %v217_v18  ;;  %vm240_vm1 = vcmp.eq.s32.totalorder %v724_v20, %v218_v19  ;;  %vm241_vm3 = vcmp.eq.s32.totalorder %v724_v20, %v219_v21  ;;  %vm242_vm4 = vcmp.eq.s32.totalorder %v724_v20, %v220_v22  ;;  %s1097_s26 = scalar_lea.vmem %s1129_s2, %s931_s14 }
  0x11   : > { %302 = vperm.xlu1 %886, %v202_v1   ;;  %296 = vperm.xlu0 %885, %v200_v2   ;;  %v201_v4 = vld [vmem:[%s187_s17 + $0x8] sm:$0xff]  ;;  %v204_v6 = vld [vmem:[%s187_s17 + $0x20] sm:$0xff]  ;;  %v207_v7 = vld [vmem:[%s187_s17 + $0x38] sm:$0xff]  ;;  %vm243_vm6 = vcmp.eq.s32.totalorder %v724_v20, %v221_v25  ;;  %vm244_vm7 = vcmp.eq.s32.totalorder %v724_v20, %v222_v26  ;;  %vm245_vm9 = vcmp.eq.s32.totalorder %v724_v20, %v223_v27 }
  0x12   : > { %v205_v5 = vld [vmem:[%s187_s17 + $0x28] sm:$0xff]  ;;  %v206_v8 = vld [vmem:[%s187_s17 + $0x30] sm:$0xff]  ;;  %v208_v10 = vld [vmem:[%s187_s17 + $0x40] sm:$0xff]  ;;  %vm246_vm10 = vcmp.eq.s32.totalorder %v724_v20, %v224_v28  ;;  %vm247_vm12 = vcmp.eq.s32.totalorder %v724_v20, %v225_v31  ;;  %vm248_vm13 = vcmp.eq.s32.totalorder %v724_v20, %v226_v32  ;;  %vm249_vm14 = vcmp.eq.s32.totalorder %v724_v20, %v227_v33 }
  0x13   : > { %v209_v9 = vld [vmem:[%s187_s17 + $0x48] sm:$0xff]  ;;  %v211_v11 = vld [vmem:[%s187_s17 + $0x58] sm:$0xff]  ;;  %v210_v12 = vld [vmem:[%s187_s17 + $0x50] sm:$0xff]  ;;  %vm250_vm15 = vcmp.eq.s32.totalorder %v724_v20, %v228_v34 }
  0x14   : > { %v213_v13 = vld [vmem:[%s187_s17 + $0x68] sm:$0xff]  ;;  %v212_v14 = vld [vmem:[%s187_s17 + $0x60] sm:$0xff]  ;;  %v215_v15 = vld [vmem:[%s187_s17 + $0x78] sm:$0xff] }
  0x15   : > { %305 = vperm.xlu1 %886, %v203_v3   ;;  %299 = vperm.xlu0 %885, %v201_v4   ;;  %v214_v16 = vld [vmem:[%s187_s17 + $0x70] sm:$0xff]  ;;  %vm773_vm2 = vmpackc.low %vm240_vm1, %vm239_vm0  ;;  %vm251_vm1 = vcmp.eq.s32.totalorder %v724_v20, %v229_v35 }
  0x16   : > { %842 = vmatprep.mubr.msk.bf16.mxu0 %vm773_vm2, %v898_v23  ;;  %vm942_vm5 = vmpackc.low %vm242_vm4, %vm241_vm3  ;;  %vm252_vm2 = vcmp.eq.s32.totalorder %v724_v20, %v230_v36  ;;  %vm253_vm3 = vcmp.eq.s32.totalorder %v724_v20, %v231_v37  ;;  %vm254_vm4 = vcmp.eq.s32.totalorder %v724_v20, %v232_v38 }
  0x17   : > { %vm946_vm8 = vmpackc.low %vm244_vm7, %vm243_vm6 }
  0x18   : > { %vm950_vm11 = vmpackc.low %vm246_vm10, %vm245_vm9 }
  0x19   : > { %311 = vperm.xlu1 %886, %v205_v5   ;;  %308 = vperm.xlu0 %885, %v204_v6   ;;  %vm781_vm0 = vmpackc.low %vm248_vm13, %vm247_vm12 }
  0x1a   : > { %850 = vmatprep.mubr.msk.bf16.mxu1 %vm781_vm0, %v898_v23  ;;  %vm955_vm6 = vmpackc.low %vm250_vm15, %vm249_vm14 }
  0x1b   : > { %vm959_vm7 = vmpackc.low %vm252_vm2, %vm251_vm1 }
  0x1c   : > { %vm963_vm9 = vmpackc.low %vm254_vm4, %vm253_vm3 }
  0x1d   : > { %317 = vperm.xlu1 %886, %v207_v7   ;;  %314 = vperm.xlu0 %885, %v206_v8  }
  0x21   : > { %323 = vperm.xlu1 %886, %v209_v9   ;;  %320 = vperm.xlu0 %885, %v208_v10  }
  0x25   : > { %329 = vperm.xlu1 %886, %v211_v11   ;;  %326 = vperm.xlu0 %885, %v210_v12  }
  0x29   : > { %335 = vperm.xlu1 %886, %v213_v13   ;;  %332 = vperm.xlu0 %885, %v212_v14  }
  0x2d   : > { %341 = vperm.xlu1 %886, %v215_v15   ;;  %338 = vperm.xlu0 %885, %v214_v16  }
  0x90   : > { %v303_v42 = vpop.permute.xlu1 %302  ;;  %v297_v43 = vpop.permute.xlu0 %296 }
  0x91   : > { %vm345_vm12 = vcmp.eq.s32.totalorder %v303_v42, %v967_v44  ;;  %vm343_vm13 = vcmp.eq.s32.totalorder %v297_v43, %v967_v44 }
  0x94   : > { %v306_v45 = vpop.permute.xlu1 %305  ;;  %v300_v46 = vpop.permute.xlu0 %299 }
  0x95   : > { %vm344_vm10 = vcmp.eq.s32.totalorder %v300_v46, %v967_v44  ;;  %vm346_vm14 = vcmp.eq.s32.totalorder %v306_v45, %v967_v44 }
  0x96   : > { %vm757_vm15 = vmpackc.low %vm344_vm10, %vm343_vm13 }
  0x97   : > { %826 = vmatprep.subr.msk.bf16.mxu0 %vm757_vm15, %v898_v23  ;;  %858 = vmatprep.subr.msk.bf16.mxu1 %vm757_vm15, %v898_v23  ;;  %vm759_vm0 = vmpackc.low %vm346_vm14, %vm345_vm12 }
  0x98   : > { %v312_v47 = vpop.permute.xlu1 %311  ;;  %v309_v48 = vpop.permute.xlu0 %308  ;;  %827 = vmatpush3.bf16.msk.msra.mxu0 %vm757_vm15, %v898_v23  ;;  %866 = vmatpush3.bf16.msk.msra.mxu1 %vm757_vm15, %v898_v23 }
  0x99   : > { %vm348_vm1 = vcmp.eq.s32.totalorder %v312_v47, %v967_v44  ;;  %vm347_vm2 = vcmp.eq.s32.totalorder %v309_v48, %v967_v44  ;;  %828 = vmatprep.subr.msk.bf16.mxu0 %vm759_vm0, %v898_v23  ;;  %859 = vmatprep.subr.msk.bf16.mxu1 %vm759_vm0, %v898_v23 }
  0x9a   : > { %vm761_vm3 = vmpackc.low %vm348_vm1, %vm347_vm2 }
  0x9c   : > { %v318_v49 = vpop.permute.xlu1 %317  ;;  %v315_v50 = vpop.permute.xlu0 %314  ;;  %829 = vmatpush3.bf16.msk.msra.mxu0 %vm759_vm0, %v898_v23  ;;  %867 = vmatpush3.bf16.msk.msra.mxu1 %vm759_vm0, %v898_v23 }
  0x9d   : > { %vm350_vm4 = vcmp.eq.s32.totalorder %v318_v49, %v967_v44  ;;  %vm349_vm10 = vcmp.eq.s32.totalorder %v315_v50, %v967_v44  ;;  %830 = vmatprep.subr.msk.bf16.mxu0 %vm761_vm3, %v898_v23  ;;  %860 = vmatprep.subr.msk.bf16.mxu1 %vm761_vm3, %v898_v23 }
  0x9e   : > { %vm763_vm12 = vmpackc.low %vm350_vm4, %vm349_vm10 }
  0xa0   : > { %v324_v51 = vpop.permute.xlu1 %323  ;;  %v321_v52 = vpop.permute.xlu0 %320  ;;  %831 = vmatpush3.bf16.msk.msra.mxu0 %vm761_vm3, %v898_v23  ;;  %868 = vmatpush3.bf16.msk.msra.mxu1 %vm761_vm3, %v898_v23 }
  0xa1   : > { %vm352_vm13 = vcmp.eq.s32.totalorder %v324_v51, %v967_v44  ;;  %vm351_vm14 = vcmp.eq.s32.totalorder %v321_v52, %v967_v44  ;;  %832 = vmatprep.subr.msk.bf16.mxu0 %vm763_vm12, %v898_v23  ;;  %861 = vmatprep.subr.msk.bf16.mxu1 %vm763_vm12, %v898_v23 }
  0xa2   : > { %vm765_vm15 = vmpackc.low %vm352_vm13, %vm351_vm14 }
  0xa4   : > { %v330_v53 = vpop.permute.xlu1 %329  ;;  %v327_v54 = vpop.permute.xlu0 %326  ;;  %833 = vmatpush3.bf16.msk.msra.mxu0 %vm763_vm12, %v898_v23  ;;  %869 = vmatpush3.bf16.msk.msra.mxu1 %vm763_vm12, %v898_v23 }
  0xa5   : > { %vm354_vm0 = vcmp.eq.s32.totalorder %v330_v53, %v967_v44  ;;  %vm353_vm1 = vcmp.eq.s32.totalorder %v327_v54, %v967_v44  ;;  %834 = vmatprep.subr.msk.bf16.mxu0 %vm765_vm15, %v898_v23  ;;  %862 = vmatprep.subr.msk.bf16.mxu1 %vm765_vm15, %v898_v23 }
  0xa6   : > { %vm767_vm2 = vmpackc.low %vm354_vm0, %vm353_vm1 }
  0xa8   : > { %v336_v55 = vpop.permute.xlu1 %335  ;;  %v333_v56 = vpop.permute.xlu0 %332  ;;  %835 = vmatpush3.bf16.msk.msra.mxu0 %vm765_vm15, %v898_v23  ;;  %870 = vmatpush3.bf16.msk.msra.mxu1 %vm765_vm15, %v898_v23 }
  0xa9   : > { %vm356_vm3 = vcmp.eq.s32.totalorder %v336_v55, %v967_v44  ;;  %vm355_vm4 = vcmp.eq.s32.totalorder %v333_v56, %v967_v44  ;;  %836 = vmatprep.subr.msk.bf16.mxu0 %vm767_vm2, %v898_v23  ;;  %863 = vmatprep.subr.msk.bf16.mxu1 %vm767_vm2, %v898_v23 }
  0xaa   : > { %vm769_vm10 = vmpackc.low %vm356_vm3, %vm355_vm4 }
  0xac   : > { %v342_v57 = vpop.permute.xlu1 %341  ;;  %v339_v58 = vpop.permute.xlu0 %338  ;;  %837 = vmatpush3.bf16.msk.msra.mxu0 %vm767_vm2, %v898_v23  ;;  %871 = vmatpush3.bf16.msk.msra.mxu1 %vm767_vm2, %v898_v23 }
  0xad   : > { %vm358_vm12 = vcmp.eq.s32.totalorder %v342_v57, %v967_v44  ;;  %vm357_vm13 = vcmp.eq.s32.totalorder %v339_v58, %v967_v44  ;;  %838 = vmatprep.subr.msk.bf16.mxu0 %vm769_vm10, %v898_v23  ;;  %864 = vmatprep.subr.msk.bf16.mxu1 %vm769_vm10, %v898_v23 }
  0xae   : > { %vm771_vm14 = vmpackc.low %vm358_vm12, %vm357_vm13 }
  0xb0   : > { %839 = vmatpush3.bf16.msk.msra.mxu0 %vm769_vm10, %v898_v23  ;;  %872 = vmatpush3.bf16.msk.msra.mxu1 %vm769_vm10, %v898_v23 }
  0xb1   : > { %840 = vmatprep.subr.msk.bf16.mxu0 %vm771_vm14, %v898_v23  ;;  %865 = vmatprep.subr.msk.bf16.mxu1 %vm771_vm14, %v898_v23 }
  0xb4   : > { %841 = vmatpush3.bf16.msk.msra.mxu0 %vm771_vm14, %v898_v23  ;;  %873 = vmatpush3.bf16.msk.msra.mxu1 %vm771_vm14, %v898_v23 }
  0xb7   : > { %843 = vmatmul.mubr.msk.bf16.vlgmr.msra.gmra.mrb[0].mxu0 %vm942_vm5, %v898_v23  ;;  %851 = vmatmul.mubr.msk.bf16.vlgmr.msra.gmra.mrb[0].mxu1 %vm955_vm6, %v898_v23 }
  0xb8   : > { %846 = vmatprep.mubr.msk.bf16.mxu0 %vm946_vm8, %v898_v23  ;;  %854 = vmatprep.mubr.msk.bf16.mxu1 %vm959_vm7, %v898_v23 }
  0xbf   : > { %847 = vmatmul.mubr.msk.bf16.gmra.mrb[4].mxu0 %vm950_vm11, %v898_v23  ;;  %855 = vmatmul.mubr.msk.bf16.gmra.mrb[4].mxu1 %vm963_vm9, %v898_v23 }
 0x18a   : > { %v844_v59 = vpop.f32.mrb[0].mxu0  ;;  %v852_v60 = vpop.f32.mrb[0].mxu1 }
 0x18b   : > { %vm498_vm5 = vcmp.gt.f32.partialorder %v844_v59, 0.0  ;;  %v433_v61 = vpop.f32.mrb[1].mxu0  ;;  %vm506_vm8 = vcmp.gt.f32.partialorder %v852_v60, 0.0  ;;  %v465_v62 = vpop.f32.mrb[1].mxu1 }
 0x18c   : > { %v1041_v0 = vsel %vm498_vm5, 1.0, %v899_v63  ;;  %vm496_vm11 = vcmp.gt.f32.partialorder %v433_v61, 0.0  ;;  %v845_v1 = vpop.f32.mrb[2].mxu0  ;;  %v1043_v2 = vsel %vm506_vm8, 1.0, %v899_v63  ;;  %vm504_vm6 = vcmp.gt.f32.partialorder %v465_v62, 0.0  ;;  %v853_v3 = vpop.f32.mrb[2].mxu1 }
 0x18d   : > { %570 = vst [vmem:[%s1039_s23 + $0x10] sm:$0xff] %v1041_v0  ;;  %v1047_v4 = vsel %vm496_vm11, 1.0, %v899_v63  ;;  %vm499_vm7 = vcmp.gt.f32.partialorder %v845_v1, 0.0  ;;  %v436_v5 = vpop.f32.mrb[3].mxu0  ;;  %578 = vst [vmem:[%s1039_s23 + $0x50] sm:$0xff] %v1043_v2  ;;  %v1051_v6 = vsel %vm504_vm6, 1.0, %v899_v63 }
 0x18e   : > { %vm507_vm9 = vcmp.gt.f32.partialorder %v853_v3, 0.0  ;;  %v468_v7 = vpop.f32.mrb[3].mxu1  ;;  %568 = vst [vmem:[%s1039_s23] sm:$0xff] %v1047_v4  ;;  %v1055_v8 = vsel %vm499_vm7, 1.0, %v899_v63  ;;  %vm497_vm15 = vcmp.gt.f32.partialorder %v436_v5, 0.0  ;;  %576 = vst [vmem:[%s1039_s23 + $0x40] sm:$0xff] %v1051_v6 }
 0x18f   : > { %v1059_v9 = vsel %vm507_vm9, 1.0, %v899_v63  ;;  %vm505_vm0 = vcmp.gt.f32.partialorder %v468_v7, 0.0  ;;  %571 = vst [vmem:[%s1039_s23 + $0x18] sm:$0xff] %v1055_v8  ;;  %v1063_v10 = vsel %vm497_vm15, 1.0, %v899_v63 }
 0x190   : > { %579 = vst [vmem:[%s1039_s23 + $0x58] sm:$0xff] %v1059_v9  ;;  %v1067_v11 = vsel %vm505_vm0, 1.0, %v899_v63  ;;  %v544_v12 = vadd.f32 %v1063_v10, %v1047_v4  ;;  %569 = vst [vmem:[%s1039_s23 + $0x8] sm:$0xff] %v1063_v10 }
 0x191   : > { %577 = vst [vmem:[%s1039_s23 + $0x48] sm:$0xff] %v1067_v11 }
 0x192   : > { %v545_v13 = vadd.f32 %v1041_v0, %v544_v12  ;;  %v848_v14 = vpop.f32.mrb[4].mxu0  ;;  %v856_v15 = vpop.f32.mrb[4].mxu1 }
 0x193   : > { %vm502_vm1 = vcmp.gt.f32.partialorder %v848_v14, 0.0  ;;  %v449_v16 = vpop.f32.mrb[5].mxu0  ;;  %vm510_vm2 = vcmp.gt.f32.partialorder %v856_v15, 0.0  ;;  %v481_v17 = vpop.f32.mrb[5].mxu1 }
 0x194   : > { %v795_v18 = vsel %vm502_vm1, 1.0, %v899_v63  ;;  %vm500_vm3 = vcmp.gt.f32.partialorder %v449_v16, 0.0  ;;  %v546_v19 = vadd.f32 %v1055_v8, %v545_v13  ;;  %v849_v20 = vpop.f32.mrb[6].mxu0  ;;  %v1077_v21 = vsel %vm510_vm2, 1.0, %v899_v63  ;;  %v857_v22 = vpop.f32.mrb[6].mxu1 }
 0x195   : > { %574 = vst [vmem:[%s1039_s23 + $0x30] sm:$0xff] %v795_v18  ;;  %v793_v23 = vsel %vm500_vm3, 1.0, %v899_v63  ;;  %vm503_vm4 = vcmp.gt.f32.partialorder %v849_v20, 0.0  ;;  %v452_v24 = vpop.f32.mrb[7].mxu0  ;;  %582 = vst [vmem:[%s1039_s23 + $0x70] sm:$0xff] %v1077_v21  ;;  %vm508_vm10 = vcmp.gt.f32.partialorder %v481_v17, 0.0 }
 0x196   : > { %vm511_vm12 = vcmp.gt.f32.partialorder %v857_v22, 0.0  ;;  %v484_v25 = vpop.f32.mrb[7].mxu1  ;;  %v547_v26 = vadd.f32 %v793_v23, %v546_v19  ;;  %572 = vst [vmem:[%s1039_s23 + $0x20] sm:$0xff] %v793_v23  ;;  %v796_v27 = vsel %vm503_vm4, 1.0, %v899_v63  ;;  %vm501_vm13 = vcmp.gt.f32.partialorder %v452_v24, 0.0 }
 0x197   : > { %v801_v28 = vsel %vm508_vm10, 1.0, %v899_v63  ;;  %575 = vst [vmem:[%s1039_s23 + $0x38] sm:$0xff] %v796_v27  ;;  %v794_v29 = vsel %vm501_vm13, 1.0, %v899_v63  ;;  %v804_v30 = vsel %vm511_vm12, 1.0, %v899_v63  ;;  %vm509_vm14 = vcmp.gt.f32.partialorder %v484_v25, 0.0 }
 0x198   : > { %580 = vst [vmem:[%s1039_s23 + $0x60] sm:$0xff] %v801_v28  ;;  %v548_v31 = vadd.f32 %v794_v29, %v547_v26  ;;  %573 = vst [vmem:[%s1039_s23 + $0x28] sm:$0xff] %v794_v29  ;;  %v802_v32 = vsel %vm509_vm14, 1.0, %v899_v63 }
 0x199   : > { %583 = vst [vmem:[%s1039_s23 + $0x78] sm:$0xff] %v804_v30  ;;  %581 = vst [vmem:[%s1039_s23 + $0x68] sm:$0xff] %v802_v32 }
 0x19a   : > { %v549_v33 = vadd.f32 %v795_v18, %v548_v31 }
 0x19c   : > { %v550_v34 = vadd.f32 %v796_v27, %v549_v33 }
 0x19e   : > { %v551_v35 = vadd.f32 %v1051_v6, %v550_v34 }
 0x1a0   : > { %v552_v36 = vadd.f32 %v1067_v11, %v551_v35 }
 0x1a2   : > { %v553_v37 = vadd.f32 %v1043_v2, %v552_v36 }
 0x1a4   : > { %v554_v38 = vadd.f32 %v1059_v9, %v553_v37 }
 0x1a6   : > { %v555_v39 = vadd.f32 %v801_v28, %v554_v38 }
 0x1a8   : > { %v556_v40 = vadd.f32 %v802_v32, %v555_v39 }
 0x1aa   : > { %v557_v41 = vadd.f32 %v1077_v21, %v556_v40 }
 0x1ac   : > { %v558_v42 = vadd.f32 %v804_v30, %v557_v41 }
 0x1ae   : > { %v559_v43 = vrot.slane %v558_v42, 4 }
 0x1b0   : > { %v560_v44 = vadd.f32 %v559_v43, %v558_v42 }
 0x1b2   : > { %v561_v45 = vrot.slane %v560_v44, 2 }
 0x1b4   : > { %v562_v46 = vadd.f32 %v561_v45, %v560_v44 }
 0x1b6   : > { %v563_v47 = vrot.slane %v562_v46, 1 }
 0x1b8   : > { %v564_v48 = vadd.f32 %v563_v47, %v562_v46 }
 0x1ba   : > { %887 = vrcp.f32 %v564_v48  ;;  %vm565_vm5 = vcmp.gt.f32.partialorder %v564_v48, 0.0 }
 0x1c4   : > { %v888_v49 = vpop.eup %887 }
 0x1c5   : > { %v567_v50 = vsel %vm565_vm5, %v888_v49, 0.0 }
 0x1c6   : > { %v584_v51 = vmul.f32 %v1047_v4, %v567_v50  ;;  %v585_v52 = vmul.f32 %v1063_v10, %v567_v50  ;;  %v586_v53 = vmul.f32 %v1041_v0, %v567_v50  ;;  %v587_v54 = vmul.f32 %v1055_v8, %v567_v50 }
 0x1c7   : > { %v588_v55 = vmul.f32 %v793_v23, %v567_v50  ;;  %v589_v56 = vmul.f32 %v794_v29, %v567_v50  ;;  %v590_v57 = vmul.f32 %v795_v18, %v567_v50  ;;  %v591_v58 = vmul.f32 %v796_v27, %v567_v50 }
 0x1c8   : > { %v592_v59 = vmul.f32 %v1051_v6, %v567_v50  ;;  %v593_v60 = vmul.f32 %v1067_v11, %v567_v50  ;;  %v594_v61 = vmul.f32 %v1043_v2, %v567_v50  ;;  %v595_v62 = vmul.f32 %v1059_v9, %v567_v50  ;;  %600 = vst [vmem:[%s1097_s26] sm:$0xff] %v584_v51 }
 0x1c9   : > { %601 = vst [vmem:[%s1097_s26 + $0x8] sm:$0xff] %v585_v52  ;;  %602 = vst [vmem:[%s1097_s26 + $0x10] sm:$0xff] %v586_v53  ;;  %v596_v63 = vmul.f32 %v801_v28, %v567_v50  ;;  %v597_v0 = vmul.f32 %v802_v32, %v567_v50  ;;  %v598_v1 = vmul.f32 %v1077_v21, %v567_v50 }
 0x1ca   : > { %603 = vst [vmem:[%s1097_s26 + $0x18] sm:$0xff] %v587_v54  ;;  %v599_v3 = vmul.f32 %v804_v30, %v567_v50  ;;  %604 = vst [vmem:[%s1097_s26 + $0x20] sm:$0xff] %v588_v55 }
 0x1cb   : > { %605 = vst [vmem:[%s1097_s26 + $0x28] sm:$0xff] %v589_v56  ;;  %606 = vst [vmem:[%s1097_s26 + $0x30] sm:$0xff] %v590_v57 }
 0x1cc   : > { %607 = vst [vmem:[%s1097_s26 + $0x38] sm:$0xff] %v591_v58  ;;  %608 = vst [vmem:[%s1097_s26 + $0x40] sm:$0xff] %v592_v59 }
 0x1cd   : > { %609 = vst [vmem:[%s1097_s26 + $0x48] sm:$0xff] %v593_v60  ;;  %610 = vst [vmem:[%s1097_s26 + $0x50] sm:$0xff] %v594_v61 }
 0x1ce   : > { %611 = vst [vmem:[%s1097_s26 + $0x58] sm:$0xff] %v595_v62  ;;  %612 = vst [vmem:[%s1097_s26 + $0x60] sm:$0xff] %v596_v63 }
 0x1cf   : > { %613 = vst [vmem:[%s1097_s26 + $0x68] sm:$0xff] %v597_v0  ;;  %614 = vst [vmem:[%s1097_s26 + $0x70] sm:$0xff] %v598_v1 }
 0x1d0   : > { %615 = vst [vmem:[%s1097_s26 + $0x78] sm:$0xff] %v599_v3 }
 0x1d1 PF: > { %s14_s12 = sadd.s32 1, %s895_s12  }
 0x1d2   : > { %p11_p4 = scmp.ge.s32.totalorder %s14_s12, 4  }
 0x1d4   :  { %13 = sbr.rel (!%p11_p4) target bundleno = 1 (0x1), region = 73 }

</bundles_post_ra>
